<compile_context>
chip_gen: v5e
topology: v5e:2x2
jax: 0.10.0
libtpu: 0.0.40
codegen_flags: <defaults>
</compile_context>

<pallas_src>
import functools

import jax
import jax.numpy as jnp
from jax.experimental import pallas as pl
from jax.experimental.pallas import tpu as pltpu


def _amsoftmax_kernel(feat_ref, centers_ref, inv_f_ref, inv_c_ref, label_ref,
                      logits_ref, margin_ref, *, s, m, tile_c):
    """Compute one (batch-tile, class-tile) block of AM-Softmax logits."""
    j = pl.program_id(1)                                   # class-tile index

    # Raw (un-normalized) dot on the MXU, NT contraction, f32 accumulation.
    # Operands already arrive in the matmul dtype (bf16 by default), so the
    # streamed centers tile goes straight from DMA to the MXU.
    raw = jax.lax.dot_general(
        feat_ref[...], centers_ref[...],
        dimension_numbers=(((1,), (1,)), ((), ())),
        preferred_element_type=jnp.float32)                # (tile_b, tile_c)

    # Fold both L2 normalizations in as cheap post-dot row / column scales:
    #   logits = (feat @ centers.T) * (1/||feat||)_row * (1/||centers||)_col
    logits = raw * inv_f_ref[...] * inv_c_ref[...]

    # Fused additive margin: subtract s*m only at the label column.
    class_ids = (jax.lax.broadcasted_iota(jnp.int32, logits.shape, 1)
                 + j * tile_c)
    sl = jnp.float32(s) * logits
    margin = jnp.where(class_ids == label_ref[...],
                       sl - jnp.float32(s * m), sl)

    logits_ref[...] = logits
    margin_ref[...] = margin


def amsoftmax_forward(feat, centers, label, *, s=20.0, m=0.5,
                      tile_c=1024, tile_b=256, matmul_dtype=jnp.bfloat16):
    """feat: (B, D), centers: (C, D), label: (B,) int -> (logits, margin)."""
    B, D = feat.shape
    C, D2 = centers.shape
    assert D == D2, "feat / centers enc_dim mismatch"

    feat = feat.astype(jnp.float32)
    centers = centers.astype(jnp.float32)
    eps = jnp.float32(1e-24)

    # Precompute inverse L2 norms once (f32, eps-guarded so zero / padded rows
    # give 0 instead of NaN) and fold them into post-dot scales.
    inv_f = jax.lax.rsqrt(jnp.maximum(
        jnp.sum(feat * feat, axis=-1, keepdims=True), eps))        # (B, 1)
    inv_c = jax.lax.rsqrt(jnp.maximum(
        jnp.sum(centers * centers, axis=-1), eps)).reshape(1, C)   # (1, C)

    # MXU operands in matmul dtype (bf16 default): halves the centers HBM
    # stream; accumulation stays f32.
    feat_mm = feat.astype(matmul_dtype)
    centers_mm = centers.astype(matmul_dtype)

    # Class tiling: lane-dense multiple of 128, clipped for small num_classes.
    tile_c = max(128, (int(tile_c) // 128) * 128)
    tile_c = min(tile_c, pl.cdiv(C, 128) * 128)
    c_pad = pl.cdiv(C, tile_c) * tile_c

    # Batch tiling: keeps the two f32 output double-buffers bounded at large B;
    # a full-B block (no padding/constraint) for small B.
    if B > tile_b:
        tile_b = max(8, (int(tile_b) // 8) * 8)
        b_pad = pl.cdiv(B, tile_b) * tile_b
    else:
        tile_b = B
        b_pad = B

    if c_pad != C:
        centers_mm = jnp.pad(centers_mm, ((0, c_pad - C), (0, 0)))
        inv_c = jnp.pad(inv_c, ((0, 0), (0, c_pad - C)))
    label = label.astype(jnp.int32)
    if b_pad != B:
        feat_mm = jnp.pad(feat_mm, ((0, b_pad - B), (0, 0)))
        inv_f = jnp.pad(inv_f, ((0, b_pad - B), (0, 0)))
        label = jnp.pad(label, (0, b_pad - B), constant_values=-1)
    label2d = label.reshape(b_pad, 1)

    kernel = functools.partial(_amsoftmax_kernel, s=float(s), m=float(m),
                               tile_c=tile_c)

    grid = (b_pad // tile_b, c_pad // tile_c)

    # Explicit VMEM budget: streamed operands double-buffered + two f32 output
    # double-buffers + small scale/label blocks, with 2x headroom; clamped so
    # it stays within every generation's physical VMEM (v7x: 64 MiB).
    itemsize = jnp.dtype(matmul_dtype).itemsize
    vmem_est = (2 * tile_c * D * itemsize            # centers tiles (2 bufs)
                + 2 * tile_b * D * itemsize          # feat tiles    (2 bufs)
                + 2 * 2 * tile_b * tile_c * 4        # 2 f32 outputs (2 bufs)
                + 4 * (tile_b + tile_c) * 4 + (1 << 16))
    vmem_limit = int(min(max(2 * vmem_est, 32 << 20), 96 << 20))

    logits, margin = pl.pallas_call(
        kernel,
        out_shape=(
            jax.ShapeDtypeStruct((b_pad, c_pad), jnp.float32),
            jax.ShapeDtypeStruct((b_pad, c_pad), jnp.float32),
        ),
        grid=grid,
        in_specs=[
            pl.BlockSpec((tile_b, D), lambda i, j: (i, 0)),      # feat (bf16)
            pl.BlockSpec((tile_c, D), lambda i, j: (j, 0)),      # centers (bf16, streamed)
            pl.BlockSpec((tile_b, 1), lambda i, j: (i, 0)),      # inv_f
            pl.BlockSpec((1, tile_c), lambda i, j: (0, j)),      # inv_c
            pl.BlockSpec((tile_b, 1), lambda i, j: (i, 0)),      # labels
        ],
        out_specs=(
            pl.BlockSpec((tile_b, tile_c), lambda i, j: (i, j)),
            pl.BlockSpec((tile_b, tile_c), lambda i, j: (i, j)),
        ),
        compiler_params=pltpu.CompilerParams(
            # Both axes are independent -> shardable across both TCs on v7x.
            dimension_semantics=("parallel", "parallel"),
            vmem_limit_bytes=vmem_limit),
    )(feat_mm, centers_mm, inv_f, inv_c, label2d)

    if b_pad != B or c_pad != C:
        logits = logits[:B, :C]
        margin = margin[:B, :C]
    return logits, margin


if __name__ == "__main__":
    # Small config consistent with AMSoftmax(num_classes, enc_dim).
    num_classes = 16
    enc_dim = 32
    batch = 8
    s_param = 20.0
    m_param = 0.5

    key = jax.random.PRNGKey(0)
    k_feat, k_centers, k_label = jax.random.split(key, 3)

    feat = jax.random.normal(k_feat, (batch, enc_dim), dtype=jnp.float32)
    # Stand-in for nn.Parameter(torch.randn(num_classes, enc_dim)).
    centers = jax.random.normal(k_centers, (num_classes, enc_dim),
                                dtype=jnp.float32)
    label = jax.random.randint(k_label, (batch,), 0, num_classes,
                               dtype=jnp.int32)

    logits, margin_logits = amsoftmax_forward(
        feat, centers, label, s=s_param, m=m_param)
    jax.block_until_ready((logits, margin_logits))

    # Plain-JAX reference (f32 end to end).  Kernel uses bf16 MXU inputs with
    # f32 accumulation, so allow a bf16-sized tolerance.
    nfeat = feat / jnp.linalg.norm(feat, axis=-1, keepdims=True)
    ncent = centers / jnp.linalg.norm(centers, axis=-1, keepdims=True)
    ref_logits = nfeat @ ncent.T
    ref_onehot = jax.nn.one_hot(label, num_classes, dtype=jnp.float32) * m_param
    ref_margin = s_param * (ref_logits - ref_onehot)

    assert logits.shape == (batch, num_classes)
    assert margin_logits.shape == (batch, num_classes)
    assert jnp.allclose(logits, ref_logits, atol=2e-2, rtol=1e-3)
    assert jnp.allclose(margin_logits, ref_margin, atol=5e-1, rtol=1e-3)
    print("KERNEL_OK")
</pallas_src>

<mosaic_0001>
module attributes {stable_mosaic.version = 11 : i64} {
  func.func @_amsoftmax_kernel(%arg0: i32, %arg1: i32, %arg2: memref<8x32xbf16, #tpu.memory_space<vmem>>, %arg3: memref<128x32xbf16, #tpu.memory_space<vmem>>, %arg4: memref<8x1xf32, #tpu.memory_space<vmem>>, %arg5: memref<1x128xf32, #tpu.memory_space<vmem>>, %arg6: memref<8x1xi32, #tpu.memory_space<vmem>>, %arg7: memref<8x128xf32, #tpu.memory_space<vmem>>, %arg8: memref<8x128xf32, #tpu.memory_space<vmem>>) attributes {dimension_semantics = [#tpu.dimension_semantics<parallel>, #tpu.dimension_semantics<parallel>], iteration_bounds = array<i64: 1, 1>, scalar_prefetch = 0 : i64, scratch_operands = 0 : i64, tpu.core_type = #tpu.core_type<tc>, window_params = [{transform_indices = @transform_0, window_bounds = array<i64: 8, 32>}, {transform_indices = @transform_1, window_bounds = array<i64: 128, 32>}, {transform_indices = @transform_2, window_bounds = array<i64: 8, 1>}, {transform_indices = @transform_3, window_bounds = array<i64: 1, 128>}, {transform_indices = @transform_4, window_bounds = array<i64: 8, 1>}, {transform_indices = @transform_5, window_bounds = array<i64: 8, 128>}, {transform_indices = @transform_6, window_bounds = array<i64: 8, 128>}]} {
    %c0 = arith.constant 0 : index
    %c0_0 = arith.constant 0 : index
    %0 = vector.load %arg2[%c0, %c0_0] : memref<8x32xbf16, #tpu.memory_space<vmem>>, vector<8x32xbf16>
    %c0_1 = arith.constant 0 : index
    %c0_2 = arith.constant 0 : index
    %1 = vector.load %arg3[%c0_1, %c0_2] : memref<128x32xbf16, #tpu.memory_space<vmem>>, vector<128x32xbf16>
    %cst = arith.constant dense<0.000000e+00> : vector<8x128xf32>
    %2 = tpu.matmul %0, %1, %cst {dimension_numbers = #tpu.dot_dimension_numbers<[1], [1], [0], [0], [0, 0, 1, 0], [], []>} : vector<8x32xbf16>, vector<128x32xbf16>, vector<8x128xf32> -> vector<8x128xf32>
    %c0_3 = arith.constant 0 : index
    %c0_4 = arith.constant 0 : index
    %3 = vector.load %arg4[%c0_3, %c0_4] : memref<8x1xf32, #tpu.memory_space<vmem>>, vector<8x1xf32>
    %4 = vector.broadcast %3 : vector<8x1xf32> to vector<8x128xf32>
    %5 = arith.mulf %2, %4 : vector<8x128xf32>
    %c0_5 = arith.constant 0 : index
    %c0_6 = arith.constant 0 : index
    %6 = vector.load %arg5[%c0_5, %c0_6] : memref<1x128xf32, #tpu.memory_space<vmem>>, vector<1x128xf32>
    %7 = vector.broadcast %6 : vector<1x128xf32> to vector<8x128xf32>
    %8 = arith.mulf %5, %7 : vector<8x128xf32>
    %9 = tpu.iota {dimensions = array<i32: 1>} : vector<8x128xi32>
    %c128_i32 = arith.constant 128 : i32
    %10 = arith.muli %arg1, %c128_i32 : i32
    %11 = vector.broadcast %10 : i32 to vector<8x128xi32>
    %12 = arith.addi %9, %11 : vector<8x128xi32>
    %cst_7 = arith.constant 2.000000e+01 : f32
    %13 = vector.broadcast %cst_7 : f32 to vector<8x128xf32>
    %14 = arith.mulf %13, %8 : vector<8x128xf32>
    %c0_8 = arith.constant 0 : index
    %c0_9 = arith.constant 0 : index
    %15 = vector.load %arg6[%c0_8, %c0_9] : memref<8x1xi32, #tpu.memory_space<vmem>>, vector<8x1xi32>
    %16 = vector.broadcast %15 : vector<8x1xi32> to vector<8x128xi32>
    %17 = arith.cmpi eq, %12, %16 : vector<8x128xi32>
    %cst_10 = arith.constant 1.000000e+01 : f32
    %18 = vector.broadcast %cst_10 : f32 to vector<8x128xf32>
    %19 = arith.subf %14, %18 : vector<8x128xf32>
    %20 = arith.select %17, %19, %14 : vector<8x128xi1>, vector<8x128xf32>
    %c0_11 = arith.constant 0 : index
    %c0_12 = arith.constant 0 : index
    %21 = vector.load %arg7[%c0_11, %c0_12] : memref<8x128xf32, #tpu.memory_space<vmem>>, vector<8x128xf32>
    tpu.vector_store %arg7[%c0_11, %c0_12], %8 {strides = array<i32>} : memref<8x128xf32, #tpu.memory_space<vmem>>, vector<8x128xf32>,
    %c0_13 = arith.constant 0 : index
    %c0_14 = arith.constant 0 : index
    %22 = vector.load %arg8[%c0_13, %c0_14] : memref<8x128xf32, #tpu.memory_space<vmem>>, vector<8x128xf32>
    tpu.vector_store %arg8[%c0_13, %c0_14], %20 {strides = array<i32>} : memref<8x128xf32, #tpu.memory_space<vmem>>, vector<8x128xf32>,
    return
  }
  func.func @transform_0(%arg0: i32, %arg1: i32) -> (i32, i32) {
    %c0_i32 = arith.constant 0 : i32
    %c0_i32_0 = arith.constant 0 : i32
    return %arg0, %c0_i32 : i32, i32
  }
  func.func @transform_1(%arg0: i32, %arg1: i32) -> (i32, i32) {
    %c0_i32 = arith.constant 0 : i32
    %c0_i32_0 = arith.constant 0 : i32
    return %arg1, %c0_i32 : i32, i32
  }
  func.func @transform_2(%arg0: i32, %arg1: i32) -> (i32, i32) {
    %c0_i32 = arith.constant 0 : i32
    %c0_i32_0 = arith.constant 0 : i32
    return %arg0, %c0_i32 : i32, i32
  }
  func.func @transform_3(%arg0: i32, %arg1: i32) -> (i32, i32) {
    %c0_i32 = arith.constant 0 : i32
    %c0_i32_0 = arith.constant 0 : i32
    return %c0_i32, %arg1 : i32, i32
  }
  func.func @transform_4(%arg0: i32, %arg1: i32) -> (i32, i32) {
    %c0_i32 = arith.constant 0 : i32
    %c0_i32_0 = arith.constant 0 : i32
    return %arg0, %c0_i32 : i32, i32
  }
  func.func @transform_5(%arg0: i32, %arg1: i32) -> (i32, i32) {
    %c0_i32 = arith.constant 0 : i32
    return %arg0, %arg1 : i32, i32
  }
  func.func @transform_6(%arg0: i32, %arg1: i32) -> (i32, i32) {
    %c0_i32 = arith.constant 0 : i32
    return %arg0, %arg1 : i32, i32
  }
}

</mosaic_0001>

<bundles_post_ra>
// kernel: tpu_custom_call.1
= control target key start
LH: loop header
LB: loop body
LE: loop exit
PB: predicated region body
PF: predicated region fallthrough
CT: control target
= control target key end

     0   :  { %12 = vsyncpa [#allocation3], 0  ;;  %vm81_vm0 = vcmask 261120   ;;  %s369_s0 = inlined_call_operand.vmem [shape: bf16[8,32], index: 0, kind: input, shape index: {}]   ;;  %s370_s1 = inlined_call_operand.vmem [shape: bf16[128,32], index: 1, kind: input, shape index: {}]   ;;  %s371_s2 = inlined_call_operand.vmem [shape: f32[8,1], index: 2, kind: input, shape index: {}]   ;;  %s372_s3 = inlined_call_operand.vmem [shape: f32[1,128], index: 3, kind: input, shape index: {}]   ;;  %s373_s4 = inlined_call_operand.vmem [shape: s32[8,1], index: 4, kind: input, shape index: {}]   ;;  %s374_s5 = inlined_call_operand.hbm [shape: f32[8,128], index: 5, kind: output, shape index: {0}]   ;;  %s375_s6 = inlined_call_operand.hbm [shape: f32[8,128], index: 6, kind: output, shape index: {1}]  }
   0x1   :  { %v222_v0 = vld [vmem:[%s370_s1 + $0x38] sm:$0xff] }
   0x2   :  { %v107_v1 = vsel %vm81_vm0, %v222_v0, 0 }
   0x3   :  { %13 = vsyncpa [#allocation5], 0  ;;  %109 = vmatpush.bf16.xpose.msra.mxu0 %v107_v1  ;;  %v221_v2 = vld [vmem:[%s370_s1 + $0x30] sm:$0xff]  ;;  %v220_v4 = vld [vmem:[%s370_s1 + $0x28] sm:$0xff]  ;;  %v280_v11 = vmov 0   ;;  %v134_v22 = vlaneseq  ;;  %s281_s19 = smov [#allocation2]  }
   0x4   :  { %v104_v3 = vsel %vm81_vm0, %v221_v2, 0  ;;  %v101_v5 = vsel %vm81_vm0, %v220_v4, 0  ;;  %v219_v6 = vld [vmem:[%s370_s1 + $0x20] sm:$0xff]  ;;  %v218_v8 = vld [vmem:[%s370_s1 + $0x18] sm:$0xff]  ;;  %226 = vset.pattern.permute.xlu0 %v280_v11  ;;  %v217_v12 = vld [vmem:[%s370_s1 + $0x10] sm:$0xff]  ;;  %s154_s20 = sshll.u32 %s281_s19, 4  ;;  %s155_s20 = int_to_ptr.vmem [resolvable:$true] %s154_s20 }
   0x5   :  { %v98_v7 = vsel %vm81_vm0, %v219_v6, 0  ;;  %v95_v9 = vsel %vm81_vm0, %v218_v8, 0  ;;  %v122_v10 = vld [vmem:[%s371_s2] sm:$0xff]  ;;  %v92_v13 = vsel %vm81_vm0, %v217_v12, 0  ;;  %v216_v15 = vld [vmem:[%s370_s1 + $0x8] sm:$0xff]  ;;  %s156_s22 = sshll.u32 %s374_s5, 4  ;;  %s157_s22 = int_to_ptr.hbm [resolvable:$true] %s156_s22 }
   0x6   :  { %125 = vperm.xlu0 %226, %v122_v10   ;;  %v140_v14 = vld [vmem:[%s373_s4] sm:$0xff]  ;;  %v89_v16 = vsel %vm81_vm0, %v216_v15, 0  ;;  %v135_v26 = vand.u32 127, %v134_v22  ;;  %s167_s25 = sshll.u32 %s375_s6, 4  ;;  %s168_s25 = int_to_ptr.hbm [resolvable:$true] %s167_s25 }
   0x7   :  { %v215_v17 = vld [vmem:[%s370_s1] sm:$0xff] }
   0x8   :  { %v86_v18 = vsel %vm81_vm0, %v215_v17, 0  ;;  %v24_v19 = vld [vmem:[%s369_s0] sm:$0xf]  ;;  %s282_s0 = smov [#allocation4]  }
   0x9   :  { %v227_v21 = vld [vmem:[%s372_s3] ss:$0 sm:$0xff]  ;;  %s165_s23 = sshll.u32 %s282_s0, 4  ;;  %s166_s23 = int_to_ptr.vmem [resolvable:$true] %s165_s23 }
   0xb   :  { %110 = vmatpush.bf16.xpose.msra.mxu0 %v104_v3 }
   0xe   :  { %142 = vperm.xlu0 %226, %v140_v14  }
  0x13   :  { %111 = vmatpush.bf16.xpose.msra.mxu0 %v101_v5 }
  0x1b   :  { %112 = vmatpush.bf16.xpose.msra.mxu0 %v98_v7 }
  0x23   :  { %113 = vmatpush.bf16.xpose.msra.mxu0 %v95_v9 }
  0x2b   :  { %114 = vmatpush.bf16.xpose.msra.mxu0 %v92_v13 }
  0x33   :  { %115 = vmatpush.bf16.xpose.msra.mxu0 %v89_v16 }
  0x3b   :  { %116 = vmatpush.bf16.xpose.msra.mxu0 %v86_v18 }
  0x42   :  { %213 = vmatmul.msk.bf16.vlgmr.msra.gmra.mxu0 %vm81_vm0, %v24_v19 }
  0x78   :  { %v126_v20 = vpop.permute.xlu0 %125 }
  0x80   :  { %v143_v27 = vpop.permute.xlu0 %142 }
  0x81   :  { %vm144_vm1 = vcmp.eq.s32.totalorder %v135_v26, %v143_v27 }
  0xbf   :  { %v118_v23 = vpop.f32.mrf.mxu0 }
  0xc0   :  { %v128_v24 = vmul.f32 %v126_v20, %v118_v23 }
  0xc2   :  { %v133_v25 = vmul.f32 %v227_v21, %v128_v24 }
  0xc4   :  { %v139_v28 = vmul.f32 20.0, %v133_v25  ;;  %147 = vst [vmem:[#allocation2] sm:$0xff] %v133_v25 }
  0xc5   :  { %159 = dma.vmem_to_hbm [thread:$0]  %s155_s20, 128, %s157_s22, [#allocation3]  }
  0xc6   :  { %v214_v29 = vadd.f32 -10.0, %v139_v28 }
  0xc7   :  { %v120_v30 = vpop.f32.mrf.mxu0 }
  0xc8   :  { %v146_v31 = vsel %vm144_vm1, %v214_v29, %v139_v28 }
  0xc9   :  { %148 = vst [vmem:[#allocation4] sm:$0xff] %v146_v31 }
  0xca   :  { %170 = dma.vmem_to_hbm [thread:$0]  %s166_s23, 128, %s168_s25, [#allocation5]  }
  0xcb   :  { %276 = dma.done.wait [#allocation3], 128  }
  0xcc   :  { %277 = vsyncadd [#allocation3], 4294967168 }
  0xcd   :  { %278 = dma.done.wait [#allocation5], 128  }
  0xce   :  { %279 = vsyncadd [#allocation5], 4294967168 }
  0xcf   :  { %179 = vsyncpa [#allocation3], 1 }
  0xd0   :  { %180 = vsyncpa [#allocation5], 1 }

</bundles_post_ra>
